<compile_context>
chip_gen: v7x
topology: tpu7x:2x2x1
jax: 0.10.0
libtpu: 0.0.40
codegen_flags: <defaults>
</compile_context>

<pallas_src>
import functools

import jax
import jax.numpy as jnp
from jax.experimental import pallas as pl
from jax.experimental.pallas import tpu as pltpu


# ----------------------------- Pallas kernel ------------------------------ #

def _embedding_layer_kernel(x_oh_ref, x_mh_ref, *refs, n_onehot):
    """One batch tile of the EmbeddingLayer forward.

    x_oh : (Bt, n_onehot)      int32 raw one-hot field ids (no offsets added)
    x_mh : (Bt, M)             int32 multi-hot values (any nonzero == present)
    refs : n_onehot one-hot table slabs (dim_f, E), one multi-hot slab (M, E),
           then the output ref (Bt, (n_onehot+1)*E) f32.
    """
    out_ref = refs[-1]
    slab_refs = refs[:-1]
    bt = x_oh_ref.shape[0]

    x_oh = x_oh_ref[...]                                     # (Bt, n_onehot)
    parts = []
    for f in range(n_onehot):
        slab = slab_refs[f][...]                             # (dim_f, E)
        dim_f = slab.shape[0]
        iota = jax.lax.broadcasted_iota(jnp.int32, (bt, dim_f), 1)
        onehot = (iota == x_oh[:, f:f + 1]).astype(jnp.float32)   # (Bt, dim_f)
        parts.append(jnp.dot(onehot, slab,
                             preferred_element_type=jnp.float32))  # (Bt, E)

    # Multi-hot field: sum of embeddings of active columns == mask @ slab.
    mask = (x_mh_ref[...] != 0).astype(jnp.float32)          # (Bt, M)
    parts.append(jnp.dot(mask, slab_refs[-1][...],
                         preferred_element_type=jnp.float32))      # (Bt, E)

    # Single lane-dense store of the whole tile.
    out_ref[...] = jnp.concatenate(parts, axis=-1)           # (Bt, F*E)


# ------------------------------- wrapper ----------------------------------- #

def embedding_layer_forward(table, offsets, field_num, x, *, block_b=128):
    """JAX/Pallas equivalent of EmbeddingLayer.forward.

    table   : (input_dim + 1, E) f32 embedding weight (padding row is zero)
    offsets : tuple of field_num python ints (offsets[-1] == padding idx)
    x       : (B, (field_num-1) + M) int32
    returns : (B, field_num, E) f32
    """
    offsets = tuple(int(o) for o in offsets)
    n_onehot = field_num - 1
    B, total_cols = x.shape
    M = total_cols - n_onehot
    E = table.shape[1]

    x = x.astype(jnp.int32)
    x_oh = x[:, :n_onehot]
    x_mh = x[:, n_onehot:]

    # Static per-field table slabs + the multi-hot slab (rows off[-1]+1 ..).
    slabs = [jax.lax.slice_in_dim(table, offsets[f], offsets[f + 1], axis=0)
             for f in range(n_onehot)]
    slabs.append(jax.lax.slice_in_dim(table, offsets[-1] + 1,
                                      offsets[-1] + 1 + M, axis=0))

    # Batch tile: multiple of 8 sublanes, no bigger than needed.
    block_b = max(8, min(block_b, pl.cdiv(B, 8) * 8))
    Bp = pl.cdiv(B, block_b) * block_b
    if Bp != B:
        x_oh = jnp.pad(x_oh, ((0, Bp - B), (0, 0)))
        x_mh = jnp.pad(x_mh, ((0, Bp - B), (0, 0)))

    grid = (Bp // block_b,)
    in_specs = [
        pl.BlockSpec((block_b, n_onehot), lambda i: (i, 0)),
        pl.BlockSpec((block_b, M), lambda i: (i, 0)),
    ] + [pl.BlockSpec(s.shape, lambda i: (0, 0)) for s in slabs]
    out_specs = pl.BlockSpec((block_b, field_num * E), lambda i: (i, 0))

    out = pl.pallas_call(
        functools.partial(_embedding_layer_kernel, n_onehot=n_onehot),
        out_shape=jax.ShapeDtypeStruct((Bp, field_num * E), jnp.float32),
        grid=grid,
        in_specs=in_specs,
        out_specs=out_specs,
        compiler_params=pltpu.CompilerParams(
            dimension_semantics=("parallel",)),
    )(x_oh, x_mh, *slabs)

    return out[:B].reshape(B, field_num, E)


# -------------------------- pure-JAX reference ----------------------------- #

def _reference(table, offsets, field_num, x):
    """Literal transcription of the PyTorch forward (gather-based)."""
    off = jnp.asarray(offsets, jnp.int32)
    n_onehot = field_num - 1
    one_hot_x = x[:, :n_onehot]
    multi_hot_x = x[:, n_onehot:]
    embed_x = table[one_hot_x + off[None, :-1]]              # (B, F-1, E)
    j = jnp.arange(multi_hot_x.shape[1], dtype=x.dtype)
    mh_idx = jnp.where(multi_hot_x != 0, j[None, :] + 1, 0) + off[-1]
    embed = table[mh_idx]                                     # (B, M, E)
    sum_embed = jnp.sum(embed, axis=1)                        # (B, E)
    return jnp.concatenate([embed_x, sum_embed[:, None, :]], axis=1)


# --------------------------------- demo ------------------------------------ #

if __name__ == "__main__":
    key = jax.random.PRNGKey(0)

    field_num = 4                       # 3 one-hot fields + 1 multi-hot field
    onehot_dims = (10, 7, 5)
    M = 6                               # multi-hot width
    E = 16                              # embedding dim
    B = 16                              # batch

    offsets = (0,) + tuple(int(v) for v in jnp.cumsum(jnp.asarray(onehot_dims)))
    # offsets = (0, 10, 17, 22); padding idx / multi-hot base = 22
    input_dim = offsets[-1] + M
    rows = input_dim + 1

    k_tab, k_oh, k_mh = jax.random.split(key, 3)
    table = 0.1 * jax.random.normal(k_tab, (rows, E), jnp.float32)
    table = table.at[offsets[-1]].set(0.0)   # nn.Embedding padding_idx row = 0

    oh_keys = jax.random.split(k_oh, field_num - 1)
    x_oh = jnp.stack(
        [jax.random.randint(oh_keys[f], (B,), 0, onehot_dims[f], jnp.int32)
         for f in range(field_num - 1)], axis=1)
    x_mh = jax.random.bernoulli(k_mh, 0.4, (B, M)).astype(jnp.int32)
    x = jnp.concatenate([x_oh, x_mh], axis=1)                 # (B, 9) int32

    fwd = jax.jit(embedding_layer_forward,
                  static_argnums=(1, 2), static_argnames=("block_b",))
    out = fwd(table, offsets, field_num, x)
    jax.block_until_ready(out)

    ref = _reference(table, offsets, field_num, x)
    assert out.shape == (B, field_num, E)
    assert jnp.allclose(out, ref, atol=1e-5, rtol=1e-5), \
        float(jnp.max(jnp.abs(out - ref)))

    print("KERNEL_OK")
</pallas_src>

<mosaic_0001>
module attributes {stable_mosaic.version = 11 : i64} {
  func.func @_embedding_layer_kernel(%arg0: i32, %arg1: memref<16x3xi32, #tpu.memory_space<vmem>>, %arg2: memref<16x6xi32, #tpu.memory_space<vmem>>, %arg3: memref<10x16xf32, #tpu.memory_space<vmem>>, %arg4: memref<7x16xf32, #tpu.memory_space<vmem>>, %arg5: memref<5x16xf32, #tpu.memory_space<vmem>>, %arg6: memref<6x16xf32, #tpu.memory_space<vmem>>, %arg7: memref<16x64xf32, #tpu.memory_space<vmem>>) attributes {dimension_semantics = [#tpu.dimension_semantics<parallel>], iteration_bounds = array<i64: 1>, scalar_prefetch = 0 : i64, scratch_operands = 0 : i64, tpu.core_type = #tpu.core_type<tc>, window_params = [{transform_indices = @transform_0, window_bounds = array<i64: 16, 3>}, {transform_indices = @transform_1, window_bounds = array<i64: 16, 6>}, {pipeline_mode = #tpu.pipeline_mode<synchronous>, transform_indices = @transform_2, window_bounds = array<i64: 10, 16>}, {pipeline_mode = #tpu.pipeline_mode<synchronous>, transform_indices = @transform_3, window_bounds = array<i64: 7, 16>}, {pipeline_mode = #tpu.pipeline_mode<synchronous>, transform_indices = @transform_4, window_bounds = array<i64: 5, 16>}, {pipeline_mode = #tpu.pipeline_mode<synchronous>, transform_indices = @transform_5, window_bounds = array<i64: 6, 16>}, {transform_indices = @transform_6, window_bounds = array<i64: 16, 64>}]} {
    %c0 = arith.constant 0 : index
    %c0_0 = arith.constant 0 : index
    %0 = vector.load %arg1[%c0, %c0_0] : memref<16x3xi32, #tpu.memory_space<vmem>>, vector<16x3xi32>
    %c0_1 = arith.constant 0 : index
    %c0_2 = arith.constant 0 : index
    %1 = vector.load %arg3[%c0_1, %c0_2] : memref<10x16xf32, #tpu.memory_space<vmem>>, vector<10x16xf32>
    %2 = tpu.iota {dimensions = array<i32: 1>} : vector<16x10xi32>
    %3 = vector.extract_strided_slice %0 {offsets = [0, 0], sizes = [16, 1], strides = [1, 1]} : vector<16x3xi32> to vector<16x1xi32>
    %4 = vector.broadcast %3 : vector<16x1xi32> to vector<16x10xi32>
    %5 = arith.cmpi eq, %2, %4 : vector<16x10xi32>
    %6 = arith.extui %5 : vector<16x10xi1> to vector<16x10xi32>
    %7 = arith.sitofp %6 : vector<16x10xi32> to vector<16x10xf32>
    %cst = arith.constant dense<0.000000e+00> : vector<16x16xf32>
    %8 = tpu.matmul %7, %1, %cst {dimension_numbers = #tpu.dot_dimension_numbers<[1], [0], [0], [1], [0, 0, 1, 1], [], []>} : vector<16x10xf32>, vector<10x16xf32>, vector<16x16xf32> -> vector<16x16xf32>
    %c0_3 = arith.constant 0 : index
    %c0_4 = arith.constant 0 : index
    %9 = vector.load %arg4[%c0_3, %c0_4] : memref<7x16xf32, #tpu.memory_space<vmem>>, vector<7x16xf32>
    %10 = tpu.iota {dimensions = array<i32: 1>} : vector<16x7xi32>
    %11 = vector.extract_strided_slice %0 {offsets = [0, 1], sizes = [16, 1], strides = [1, 1]} : vector<16x3xi32> to vector<16x1xi32>
    %12 = vector.broadcast %11 : vector<16x1xi32> to vector<16x7xi32>
    %13 = arith.cmpi eq, %10, %12 : vector<16x7xi32>
    %14 = arith.extui %13 : vector<16x7xi1> to vector<16x7xi32>
    %15 = arith.sitofp %14 : vector<16x7xi32> to vector<16x7xf32>
    %cst_5 = arith.constant dense<0.000000e+00> : vector<16x16xf32>
    %16 = tpu.matmul %15, %9, %cst_5 {dimension_numbers = #tpu.dot_dimension_numbers<[1], [0], [0], [1], [0, 0, 1, 1], [], []>} : vector<16x7xf32>, vector<7x16xf32>, vector<16x16xf32> -> vector<16x16xf32>
    %c0_6 = arith.constant 0 : index
    %c0_7 = arith.constant 0 : index
    %17 = vector.load %arg5[%c0_6, %c0_7] : memref<5x16xf32, #tpu.memory_space<vmem>>, vector<5x16xf32>
    %18 = tpu.iota {dimensions = array<i32: 1>} : vector<16x5xi32>
    %19 = vector.extract_strided_slice %0 {offsets = [0, 2], sizes = [16, 1], strides = [1, 1]} : vector<16x3xi32> to vector<16x1xi32>
    %20 = vector.broadcast %19 : vector<16x1xi32> to vector<16x5xi32>
    %21 = arith.cmpi eq, %18, %20 : vector<16x5xi32>
    %22 = arith.extui %21 : vector<16x5xi1> to vector<16x5xi32>
    %23 = arith.sitofp %22 : vector<16x5xi32> to vector<16x5xf32>
    %cst_8 = arith.constant dense<0.000000e+00> : vector<16x16xf32>
    %24 = tpu.matmul %23, %17, %cst_8 {dimension_numbers = #tpu.dot_dimension_numbers<[1], [0], [0], [1], [0, 0, 1, 1], [], []>} : vector<16x5xf32>, vector<5x16xf32>, vector<16x16xf32> -> vector<16x16xf32>
    %c0_9 = arith.constant 0 : index
    %c0_10 = arith.constant 0 : index
    %25 = vector.load %arg2[%c0_9, %c0_10] : memref<16x6xi32, #tpu.memory_space<vmem>>, vector<16x6xi32>
    %c0_i32 = arith.constant 0 : i32
    %26 = vector.broadcast %c0_i32 : i32 to vector<16x6xi32>
    %27 = arith.cmpi ne, %25, %26 : vector<16x6xi32>
    %28 = arith.extui %27 : vector<16x6xi1> to vector<16x6xi32>
    %29 = arith.sitofp %28 : vector<16x6xi32> to vector<16x6xf32>
    %c0_11 = arith.constant 0 : index
    %c0_12 = arith.constant 0 : index
    %30 = vector.load %arg6[%c0_11, %c0_12] : memref<6x16xf32, #tpu.memory_space<vmem>>, vector<6x16xf32>
    %cst_13 = arith.constant dense<0.000000e+00> : vector<16x16xf32>
    %31 = tpu.matmul %29, %30, %cst_13 {dimension_numbers = #tpu.dot_dimension_numbers<[1], [0], [0], [1], [0, 0, 1, 1], [], []>} : vector<16x6xf32>, vector<6x16xf32>, vector<16x16xf32> -> vector<16x16xf32>
    %32 = tpu.concatenate %8, %16, %24, %31 in 1 : vector<16x16xf32>, vector<16x16xf32>, vector<16x16xf32>, vector<16x16xf32> -> vector<16x64xf32>
    %c0_14 = arith.constant 0 : index
    %c0_15 = arith.constant 0 : index
    %33 = vector.load %arg7[%c0_14, %c0_15] : memref<16x64xf32, #tpu.memory_space<vmem>>, vector<16x64xf32>
    tpu.vector_store %arg7[%c0_14, %c0_15], %32 {strides = array<i32>} : memref<16x64xf32, #tpu.memory_space<vmem>>, vector<16x64xf32>,
    return
  }
  func.func @transform_0(%arg0: i32) -> (i32, i32) {
    %c0_i32 = arith.constant 0 : i32
    %c0_i32_0 = arith.constant 0 : i32
    return %arg0, %c0_i32 : i32, i32
  }
  func.func @transform_1(%arg0: i32) -> (i32, i32) {
    %c0_i32 = arith.constant 0 : i32
    %c0_i32_0 = arith.constant 0 : i32
    return %arg0, %c0_i32 : i32, i32
  }
  func.func @transform_2(%arg0: i32) -> (i32, i32) {
    %c0_i32 = arith.constant 0 : i32
    %c0_i32_0 = arith.constant 0 : i32
    %c0_i32_1 = arith.constant 0 : i32
    return %c0_i32, %c0_i32_0 : i32, i32
  }
  func.func @transform_3(%arg0: i32) -> (i32, i32) {
    %c0_i32 = arith.constant 0 : i32
    %c0_i32_0 = arith.constant 0 : i32
    %c0_i32_1 = arith.constant 0 : i32
    return %c0_i32, %c0_i32_0 : i32, i32
  }
  func.func @transform_4(%arg0: i32) -> (i32, i32) {
    %c0_i32 = arith.constant 0 : i32
    %c0_i32_0 = arith.constant 0 : i32
    %c0_i32_1 = arith.constant 0 : i32
    return %c0_i32, %c0_i32_0 : i32, i32
  }
  func.func @transform_5(%arg0: i32) -> (i32, i32) {
    %c0_i32 = arith.constant 0 : i32
    %c0_i32_0 = arith.constant 0 : i32
    %c0_i32_1 = arith.constant 0 : i32
    return %c0_i32, %c0_i32_0 : i32, i32
  }
  func.func @transform_6(%arg0: i32) -> (i32, i32) {
    %c0_i32 = arith.constant 0 : i32
    %c0_i32_0 = arith.constant 0 : i32
    return %arg0, %c0_i32 : i32, i32
  }
}

</mosaic_0001>

<bundles_post_ra>
// kernel: embedding_layer_forward.1
= control target key start
LH: loop header
LB: loop body
LE: loop exit
PB: predicated region body
PF: predicated region fallthrough
CT: control target
= control target key end

     0   :  { %v535_v0 = vmov 1   ;;  %vm147_vm0 = vcmask 1046528   ;;  %vm48_vm1 = vcmask 1041408   ;;  %vm536_vm2 = vmmov 1   ;;  %s541_s10 = smov 32   ;;  %s542_s11 = smov 48   ;;  %s617_s0 = inlined_call_operand.vmem [shape: s32[16,3], index: 0, kind: input, shape index: {}]   ;;  %s618_s3 = inlined_call_operand.vmem [shape: f32[7,16], index: 3, kind: input, shape index: {}]   ;;  %s619_s2 = inlined_call_operand.vmem [shape: f32[10,16], index: 2, kind: input, shape index: {}]   ;;  %s620_s4 = inlined_call_operand.vmem [shape: f32[5,16], index: 4, kind: input, shape index: {}]   ;;  %s621_s5 = inlined_call_operand.vmem [shape: f32[6,16], index: 5, kind: input, shape index: {}]   ;;  %s622_s1 = inlined_call_operand.vmem [shape: s32[16,6], index: 1, kind: input, shape index: {}]   ;;  %s623_s6 = inlined_call_operand.vmem [shape: f32[16,64], index: 6, kind: output, shape index: {}]  }
   0x1   :  { %531 = vset.pattern.permute.xlu1 %v535_v0  ;;  %529 = vset.pattern.permute.xlu0 %v535_v0  ;;  %v24_v1 = vld [vmem:[%s617_s0 + $0x8] sm:$0xff]  ;;  %v23_v2 = vld [vmem:[%s617_s0] sm:$0xff]  ;;  %vm516_vm3 = vmpackc.low %vm48_vm1, %vm536_vm2  ;;  %v537_v7 = vmov 0   ;;  %vm246_vm4 = vcmask 1044480   ;;  %v538_v8 = vmov 2   ;;  %vm341_vm5 = vcmask 1045504  }
   0x2   :  { %132 = vperm.xlu1 %531, %v24_v1   ;;  %129 = vperm.xlu0 %529, %v23_v2   ;;  %v127_v3 = vld [vmem:[%s618_s3] sm:$0x7f]  ;;  %v26_v5 = vld [vmem:[%s619_s2 + $0x8] sm:$0x3]  ;;  %v27_v11 = vlaneseq  ;;  %vm140_vm6 = vcmask 56320   ;;  %v539_v16 = vmov 0.0  }
   0x3   :  { %500 = vmatprep.subr.msk.mxu1 %vm147_vm0, %v127_v3  ;;  %v25_v4 = vld [vmem:[%s619_s2] sm:$0xff]  ;;  %v326_v19 = vld [vmem:[%s622_s1 + $0x8] sm:$0xff]  ;;  %vm41_vm10 = vcmask 80896   ;;  %vm334_vm13 = vcmask 48128   ;;  %vm239_vm15 = vcmask 39936   ;;  %vm444_vm2 = vcmask 130048  }
   0x4   :  { %501 = vmatpush3.msk.msra.mxu1 %vm147_vm0, %v127_v3  ;;  %v515_v6 = vpack.c.bf16 %v26_v5, %v25_v4  ;;  %v226_v9 = vld [vmem:[%s620_s4] sm:$0x1f]  ;;  %v28_v12 = vand.u32 127, %v27_v11  ;;  %vm328_vm14 = vcmp.ne.s32.totalorder %v326_v19, 0 }
   0x5   :  { %505 = vmatprep.subr.msk.mxu1 %vm246_vm4, %v226_v9  ;;  %v333_v10 = vld [vmem:[%s621_s5] sm:$0x3f]  ;;  %v476_v27 = vsel %vm328_vm14, 1.0, %v539_v16 }
   0x6   :  { %532 = vset.pattern.permute.xlu1 %v537_v7  ;;  %530 = vset.pattern.permute.xlu0 %v537_v7  ;;  %v325_v15 = vld [vmem:[%s622_s1] sm:$0xff]  ;;  %s540_s1 = smov 16  }
   0x7   :  { %33 = vperm.xlu1 %532, %v24_v1   ;;  %30 = vperm.xlu0 %530, %v23_v2   ;;  %vm327_vm9 = vcmp.ne.s32.totalorder %v325_v15, 0 }
   0x8   :  { %517 = vmatprep.subr.msk.bf16.mxu0 %vm516_vm3, %v515_v6  ;;  %v475_v24 = vsel %vm327_vm9, 1.0, %v539_v16 }
   0x9   :  { %520 = vmatpush3.bf16.msk.msra.mxu0 %vm516_vm3, %v515_v6  ;;  %vm447_vm3 = vcmask 261120  }
   0xa   :  { %510 = vmatprep.subr.msk.mxu0 %vm341_vm5, %v333_v10 }
   0xb   :  { %533 = vset.pattern.permute.xlu1 %v538_v8  ;;  %534 = vset.pattern.permute.xlu0 %v538_v8 }
   0xc   :  { %228 = vperm.xlu1 %533, %v23_v2   ;;  %231 = vperm.xlu0 %534, %v24_v1  }
  0x81   :  { %v133_v13 = vpop.permute.xlu1 %132  ;;  %v130_v14 = vpop.permute.xlu0 %129 }
  0x82   :  { %vm135_vm7 = vcmp.eq.s32.totalorder %v28_v12, %v133_v13  ;;  %vm134_vm8 = vcmp.eq.s32.totalorder %v28_v12, %v130_v14 }
  0x83   :  { %v466_v17 = vsel %vm135_vm7, 1.0, %v539_v16  ;;  %v465_v18 = vsel %vm134_vm8, 1.0, %v539_v16 }
  0x84   :  { %502 = vmatprep.mubr.msk.f32.mxu1 %vm140_vm6, %v465_v18 }
  0x85   :  { %503 = vmatmul.mubr.msk.f32.vlgmr.msra.gmra.mrb[0].mxu1 %vm140_vm6, %v466_v17 }
  0x86   :  { %v34_v20 = vpop.permute.xlu1 %33  ;;  %v31_v21 = vpop.permute.xlu0 %30  ;;  %506 = vmatpush3.msk.msra.mxu1 %vm246_vm4, %v226_v9  ;;  %vm450_vm4 = vcmask 392192  }
  0x87   :  { %vm36_vm11 = vcmp.eq.s32.totalorder %v28_v12, %v34_v20  ;;  %vm35_vm12 = vcmp.eq.s32.totalorder %v28_v12, %v31_v21 }
  0x88   :  { %v461_v22 = vsel %vm36_vm11, 1.0, %v539_v16  ;;  %v460_v23 = vsel %vm35_vm12, 1.0, %v539_v16 }
  0x89   :  { %497 = vmatprep.mubr.msk.f32.mxu0 %vm41_vm10, %v460_v23 }
  0x8a   :  { %498 = vmatmul.mubr.msk.f32.vlgmr.msra.gmra.mrb[0].mxu0 %vm41_vm10, %v461_v22 }
  0x8b   :  { %v229_v25 = vpop.permute.xlu1 %228  ;;  %v232_v26 = vpop.permute.xlu0 %231  ;;  %511 = vmatpush3.msk.msra.mxu0 %vm341_vm5, %v333_v10  ;;  %512 = vmatprep.mubr.msk.f32.mxu0 %vm334_vm13, %v475_v24  ;;  %vm453_vm5 = vcmask 523264  }
  0x8c   :  { %vm233_vm0 = vcmp.eq.s32.totalorder %v28_v12, %v229_v25  ;;  %vm234_vm1 = vcmp.eq.s32.totalorder %v28_v12, %v232_v26 }
  0x8d   :  { %v470_v28 = vsel %vm233_vm0, 1.0, %v539_v16  ;;  %v471_v29 = vsel %vm234_vm1, 1.0, %v539_v16 }
  0x8e   :  { %507 = vmatprep.mubr.msk.f32.mxu1 %vm239_vm15, %v470_v28  ;;  %513 = vmatmul.mubr.msk.f32.vlgmr.msra.gmra.mrb[2].mxu0 %vm334_vm13, %v476_v27 }
  0x8f   :  { %508 = vmatmul.mubr.msk.f32.vlgmr.msra.gmra.mrb[2].mxu1 %vm239_vm15, %v471_v29 }
 0x158   :  { %v504_v30 = vpop.f32.mrb[0].mxu1 }
 0x159   :  { %424 = vrot.lane.b32.xlu1 %v504_v30, %s540_s1  ;;  %v217_v31 = vpop.f32.mrb[1].mxu1 }
 0x15d   :  { %422 = vrot.lane.b32.xlu1 %v217_v31, %s540_s1  ;;  %v499_v32 = vpop.f32.mrb[0].mxu0 }
 0x15e   :  { %v118_v33 = vpop.f32.mrb[1].mxu0 }
 0x161   :  { %v514_v34 = vpop.f32.mrb[2].mxu0 }
 0x162   :  { %v509_v35 = vpop.f32.mrb[2].mxu1  ;;  %v411_v36 = vpop.f32.mrb[3].mxu0 }
 0x163   :  { %432 = vrot.lane.b32.xlu1 %v509_v35, %s541_s10  ;;  %v316_v37 = vpop.f32.mrb[3].mxu1 }
 0x164   :  { %430 = vrot.lane.b32.xlu0 %v316_v37, %s541_s10 }
 0x167   :  { %440 = vrot.lane.b32.xlu1 %v514_v34, %s542_s11 }
 0x168   :  { %438 = vrot.lane.b32.xlu0 %v411_v36, %s542_s11 }
 0x1cb   :  { %v425_v38 = vpop.permute.xlu1 %424 }
 0x1cc   :  { %v446_v42 = vsel %vm444_vm2, %v499_v32, %v425_v38 }
 0x1cf   :  { %v423_v39 = vpop.permute.xlu1 %422 }
 0x1d0   :  { %v445_v43 = vsel %vm444_vm2, %v118_v33, %v423_v39 }
 0x1d5   :  { %v433_v40 = vpop.permute.xlu1 %432 }
 0x1d6   :  { %v431_v41 = vpop.permute.xlu0 %430  ;;  %v449_v44 = vsel %vm447_vm3, %v446_v42, %v433_v40 }
 0x1d7   :  { %v448_v46 = vsel %vm447_vm3, %v445_v43, %v431_v41 }
 0x1d9   :  { %v441_v45 = vpop.permute.xlu1 %440 }
 0x1da   :  { %v452_v47 = vsel %vm450_vm4, %v449_v44, %v441_v45  ;;  %v439_v48 = vpop.permute.xlu0 %438 }
 0x1db   :  { %455 = vst.msk [vmem:[%s623_s6 + $0x8] sm:$0xff] %vm453_vm5, %v452_v47  ;;  %v451_v49 = vsel %vm450_vm4, %v448_v46, %v439_v48 }
 0x1dc   :  { %454 = vst.msk [vmem:[%s623_s6] sm:$0xff] %vm453_vm5, %v451_v49 }

</bundles_post_ra>
